<compile_context>
chip_gen: v7x
topology: tpu7x:2x2x1
jax: 0.10.0
libtpu: 0.0.40
codegen_flags: <defaults>
</compile_context>

<pallas_src>
import jax
import jax.numpy as jnp
from jax.experimental import pallas as pl
from jax.experimental.pallas import tpu as pltpu


LANE = 128        # vreg lane width   (last dim)
SUBLANE = 8       # vreg sublane width (second-to-last dim)
MAX_TILE_M = 512  # M tile if batch ever grows large


def _round_up(v, m):
    return (v + m - 1) // m * m


def _pad2d(a, rows, cols):
    r, c = a.shape
    return jnp.pad(a, ((0, rows - r), (0, cols - c)))


# ----------------------------- Pallas kernel --------------------------------
def _fused_mlp_kernel(x_ref, w_in_ref, b_in_ref, w_seq_ref, b_seq_ref,
                      w_out_ref, b_out_ref,
                      out_in_ref, out_seq_ref, out_out_ref):
    """Entire MLP (input layer + n hidden layers + output layer), fused.

    Each layer is y = relu(x @ W + b); the running activation stays in
    registers/VMEM and every layer's output is stored (for output_list).
    """
    # --- input layer ----------------------------------------------------
    h = jnp.dot(x_ref[...], w_in_ref[...], preferred_element_type=jnp.float32)
    h = jnp.maximum(h + b_in_ref[...], 0.0)
    out_in_ref[...] = h.astype(out_in_ref.dtype)

    # --- hidden (sequence) layers: static unrolled loop over stacked W ---
    n_seq = out_seq_ref.shape[0]
    for i in range(n_seq):                      # static trip count -> fully unrolled
        h = jnp.dot(h, w_seq_ref[i], preferred_element_type=jnp.float32)
        h = jnp.maximum(h + b_seq_ref[i], 0.0)
        out_seq_ref[i] = h.astype(out_seq_ref.dtype)

    # --- output layer (ReLU after the last layer, matching makeblock_dense)
    h = jnp.dot(h, w_out_ref[...], preferred_element_type=jnp.float32)
    h = jnp.maximum(h + b_out_ref[...], 0.0)
    out_out_ref[...] = h.astype(out_out_ref.dtype)


# ----------------------------- Param packing --------------------------------
def _pack_params(params):
    """Zero-pad all weights/biases to lane-dense (multiple-of-128) shapes and
    stack the identical hidden layers into single operands.

    Zero padding is exact: padded input columns of x are 0, padded weight rows
    / columns and padded bias lanes are 0, so padded output lanes stay 0 and
    never pollute the valid lanes of the next layer.
    """
    w_in, b_in = params[0]
    seq = params[1:-1]
    w_out, b_out = params[-1]

    k0, hid = w_in.shape
    last_hw = w_out.shape[1]
    k0_p = _round_up(k0, LANE)
    hid_p = _round_up(hid, LANE)
    last_p = _round_up(last_hw, LANE)

    packed = dict(
        w_in=_pad2d(w_in, k0_p, hid_p),
        b_in=jnp.pad(b_in, (0, hid_p - hid)).reshape(1, hid_p),
        w_seq=jnp.stack([_pad2d(w, hid_p, hid_p) for (w, _) in seq]),
        b_seq=jnp.stack([jnp.pad(b, (0, hid_p - hid)).reshape(1, hid_p)
                         for (_, b) in seq]),
        w_out=_pad2d(w_out, hid_p, last_p),
        b_out=jnp.pad(b_out, (0, last_p - last_hw)).reshape(1, last_p),
    )
    dims = dict(k0=k0, hid=hid, last_hw=last_hw,
                k0_p=k0_p, hid_p=hid_p, last_p=last_p, n_seq=len(seq))
    return packed, dims


# ----------------------------- Model wrapper --------------------------------
def init_model_linear_params(key, in_dim, hidden_width=64, n_layers=5,
                             last_hidden_width=None):
    """Deterministic synthetic parameter init (matches the module's shapes)."""
    last_hw = last_hidden_width if last_hidden_width else hidden_width
    dims = [(in_dim, hidden_width)]                       # input_layer
    dims += [(hidden_width, hidden_width)] * n_layers     # sequence_layer blocks
    dims += [(hidden_width, last_hw)]                     # output_layer
    params = []
    for din, dout in dims:
        key, kw, kb = jax.random.split(key, 3)
        scale = 1.0 / jnp.sqrt(jnp.float32(din))
        w = jax.random.normal(kw, (din, dout), jnp.float32) * scale
        b = jax.random.normal(kb, (dout,), jnp.float32) * scale
        params.append((w, b))
    return params


def model_linear_forward(x_nchw, params, in_dim):
    """Replicates ModelLinear.forward: returns (x, output_list)."""
    x2d = x_nchw.reshape(-1, in_dim)            # x.view(-1, self.in_width)
    m = x2d.shape[0]
    packed, d = _pack_params(params)

    # M padding / tiling. At small batches this is a single block; for large
    # batches rows split into TILE_M blocks on a "parallel" grid axis
    # (megacore / v7x TC sharding). Weights use a constant index_map.
    m_p = _round_up(m, SUBLANE)
    tile_m = m_p if m_p <= MAX_TILE_M else MAX_TILE_M
    m_p = _round_up(m_p, tile_m)
    n_m = m_p // tile_m

    x_pad = jnp.pad(x2d, ((0, m_p - m), (0, d["k0_p"] - d["k0"])))

    n_seq = d["n_seq"]
    k0_p, hid_p, last_p = d["k0_p"], d["hid_p"], d["last_p"]

    out_shapes = (
        jax.ShapeDtypeStruct((m_p, hid_p), jnp.float32),          # input-layer out
        jax.ShapeDtypeStruct((n_seq, m_p, hid_p), jnp.float32),   # hidden outs
        jax.ShapeDtypeStruct((m_p, last_p), jnp.float32),         # output-layer out
    )

    out_in, out_seq, out_out = pl.pallas_call(
        _fused_mlp_kernel,
        out_shape=out_shapes,
        grid=(n_m,),
        in_specs=[
            pl.BlockSpec((tile_m, k0_p), lambda i: (i, 0)),            # x
            pl.BlockSpec((k0_p, hid_p), lambda i: (0, 0)),             # w_in
            pl.BlockSpec((1, hid_p), lambda i: (0, 0)),                # b_in
            pl.BlockSpec((n_seq, hid_p, hid_p), lambda i: (0, 0, 0)),  # w_seq
            pl.BlockSpec((n_seq, 1, hid_p), lambda i: (0, 0, 0)),      # b_seq
            pl.BlockSpec((hid_p, last_p), lambda i: (0, 0)),           # w_out
            pl.BlockSpec((1, last_p), lambda i: (0, 0)),               # b_out
        ],
        out_specs=(
            pl.BlockSpec((tile_m, hid_p), lambda i: (i, 0)),
            pl.BlockSpec((n_seq, tile_m, hid_p), lambda i: (0, i, 0)),
            pl.BlockSpec((tile_m, last_p), lambda i: (i, 0)),
        ),
        compiler_params=pltpu.CompilerParams(
            dimension_semantics=("parallel",)),
    )(x_pad, packed["w_in"], packed["b_in"], packed["w_seq"],
      packed["b_seq"], packed["w_out"], packed["b_out"])

    # Slice row/lane padding back off so shapes match the PyTorch module.
    hid, last_hw = d["hid"], d["last_hw"]
    output_list = [out_in[:m, :hid]]
    output_list += [out_seq[i, :m, :hid] for i in range(n_seq)]
    x_final = out_out[:m, :last_hw]
    output_list.append(x_final)
    return x_final, output_list


# --------------------------------- main --------------------------------------
if __name__ == "__main__":
    key = jax.random.PRNGKey(0)
    kx, kp = jax.random.split(key)

    # data_code='mnist' -> in_width=28*28, in_ch=1; hidden_width=64, n_layers=5
    batch, in_ch, H, W = 8, 1, 28, 28
    in_dim = in_ch * H * W
    hidden_width, n_layers = 64, 5

    x = jax.random.normal(kx, (batch, in_ch, H, W), jnp.float32)
    params = init_model_linear_params(kp, in_dim, hidden_width, n_layers)

    out, outputs = model_linear_forward(x, params, in_dim)
    out = jax.block_until_ready(out)
    for o in outputs:
        jax.block_until_ready(o)

    # Reference check vs plain JAX (ReLU after every layer, incl. output_layer,
    # matching makeblock_dense(..., atype='relu') in the PyTorch module).
    ref = x.reshape(-1, in_dim)
    ref_list = []
    for w, b in params:
        ref = jnp.maximum(ref @ w + b, 0.0)
        ref_list.append(ref)

    assert out.shape == (batch, hidden_width)
    assert len(outputs) == n_layers + 2
    for got, want in zip(outputs, ref_list):
        assert got.shape == want.shape
        assert jnp.allclose(got, want, atol=1e-4, rtol=1e-4)
    assert jnp.allclose(out, ref, atol=1e-4, rtol=1e-4)

    print("KERNEL_OK")
</pallas_src>

<mosaic_0001>
module attributes {stable_mosaic.version = 11 : i64} {
  func.func @_fused_mlp_kernel(%arg0: i32, %arg1: memref<8x896xf32, #tpu.memory_space<vmem>>, %arg2: memref<896x128xf32, #tpu.memory_space<vmem>>, %arg3: memref<1x128xf32, #tpu.memory_space<vmem>>, %arg4: memref<5x128x128xf32, #tpu.memory_space<vmem>>, %arg5: memref<5x1x128xf32, #tpu.memory_space<vmem>>, %arg6: memref<128x128xf32, #tpu.memory_space<vmem>>, %arg7: memref<1x128xf32, #tpu.memory_space<vmem>>, %arg8: memref<8x128xf32, #tpu.memory_space<vmem>>, %arg9: memref<5x8x128xf32, #tpu.memory_space<vmem>>, %arg10: memref<8x128xf32, #tpu.memory_space<vmem>>) attributes {dimension_semantics = [#tpu.dimension_semantics<parallel>], iteration_bounds = array<i64: 1>, scalar_prefetch = 0 : i64, scratch_operands = 0 : i64, tpu.core_type = #tpu.core_type<tc>, window_params = [{transform_indices = @transform_0, window_bounds = array<i64: 8, 896>}, {pipeline_mode = #tpu.pipeline_mode<synchronous>, transform_indices = @transform_1, window_bounds = array<i64: 896, 128>}, {pipeline_mode = #tpu.pipeline_mode<synchronous>, transform_indices = @transform_2, window_bounds = array<i64: 1, 128>}, {pipeline_mode = #tpu.pipeline_mode<synchronous>, transform_indices = @transform_3, window_bounds = array<i64: 5, 128, 128>}, {pipeline_mode = #tpu.pipeline_mode<synchronous>, transform_indices = @transform_4, window_bounds = array<i64: 5, 1, 128>}, {pipeline_mode = #tpu.pipeline_mode<synchronous>, transform_indices = @transform_5, window_bounds = array<i64: 128, 128>}, {pipeline_mode = #tpu.pipeline_mode<synchronous>, transform_indices = @transform_6, window_bounds = array<i64: 1, 128>}, {transform_indices = @transform_7, window_bounds = array<i64: 8, 128>}, {transform_indices = @transform_8, window_bounds = array<i64: 5, 8, 128>}, {transform_indices = @transform_9, window_bounds = array<i64: 8, 128>}]} {
    %c0 = arith.constant 0 : index
    %c0_0 = arith.constant 0 : index
    %0 = vector.load %arg1[%c0, %c0_0] : memref<8x896xf32, #tpu.memory_space<vmem>>, vector<8x896xf32>
    %c0_1 = arith.constant 0 : index
    %c0_2 = arith.constant 0 : index
    %1 = vector.load %arg2[%c0_1, %c0_2] : memref<896x128xf32, #tpu.memory_space<vmem>>, vector<896x128xf32>
    %cst = arith.constant dense<0.000000e+00> : vector<8x128xf32>
    %2 = tpu.matmul %0, %1, %cst {dimension_numbers = #tpu.dot_dimension_numbers<[1], [0], [0], [1], [0, 0, 1, 1], [], []>} : vector<8x896xf32>, vector<896x128xf32>, vector<8x128xf32> -> vector<8x128xf32>
    %c0_3 = arith.constant 0 : index
    %c0_4 = arith.constant 0 : index
    %3 = vector.load %arg3[%c0_3, %c0_4] : memref<1x128xf32, #tpu.memory_space<vmem>>, vector<1x128xf32>
    %4 = vector.broadcast %3 : vector<1x128xf32> to vector<8x128xf32>
    %5 = arith.addf %2, %4 : vector<8x128xf32>
    %cst_5 = arith.constant 0.000000e+00 : f32
    %6 = vector.broadcast %cst_5 : f32 to vector<8x128xf32>
    %7 = arith.maximumf %5, %6 : vector<8x128xf32>
    %c0_6 = arith.constant 0 : index
    %c0_7 = arith.constant 0 : index
    %8 = vector.load %arg8[%c0_6, %c0_7] : memref<8x128xf32, #tpu.memory_space<vmem>>, vector<8x128xf32>
    tpu.vector_store %arg8[%c0_6, %c0_7], %7 {strides = array<i32>} : memref<8x128xf32, #tpu.memory_space<vmem>>, vector<8x128xf32>,
    %c0_8 = arith.constant 0 : index
    %c0_9 = arith.constant 0 : index
    %c0_10 = arith.constant 0 : index
    %9 = vector.load %arg4[%c0_8, %c0_9, %c0_10] : memref<5x128x128xf32, #tpu.memory_space<vmem>>, vector<1x128x128xf32>
    %10 = vector.shape_cast %9 : vector<1x128x128xf32> to vector<128x128xf32>
    %cst_11 = arith.constant dense<0.000000e+00> : vector<8x128xf32>
    %11 = tpu.matmul %7, %10, %cst_11 {dimension_numbers = #tpu.dot_dimension_numbers<[1], [0], [0], [1], [0, 0, 1, 1], [], []>} : vector<8x128xf32>, vector<128x128xf32>, vector<8x128xf32> -> vector<8x128xf32>
    %c0_12 = arith.constant 0 : index
    %c0_13 = arith.constant 0 : index
    %c0_14 = arith.constant 0 : index
    %12 = vector.load %arg5[%c0_12, %c0_13, %c0_14] : memref<5x1x128xf32, #tpu.memory_space<vmem>>, vector<1x1x128xf32>
    %13 = vector.shape_cast %12 : vector<1x1x128xf32> to vector<1x128xf32>
    %14 = vector.broadcast %13 : vector<1x128xf32> to vector<8x128xf32>
    %15 = arith.addf %11, %14 : vector<8x128xf32>
    %cst_15 = arith.constant 0.000000e+00 : f32
    %16 = vector.broadcast %cst_15 : f32 to vector<8x128xf32>
    %17 = arith.maximumf %15, %16 : vector<8x128xf32>
    %c0_16 = arith.constant 0 : index
    %c0_17 = arith.constant 0 : index
    %c0_18 = arith.constant 0 : index
    %18 = vector.load %arg9[%c0_16, %c0_17, %c0_18] : memref<5x8x128xf32, #tpu.memory_space<vmem>>, vector<1x8x128xf32>
    %19 = vector.shape_cast %18 : vector<1x8x128xf32> to vector<8x128xf32>
    %20 = vector.shape_cast %17 : vector<8x128xf32> to vector<1x8x128xf32>
    tpu.vector_store %arg9[%c0_16, %c0_17, %c0_18], %20 {strides = array<i32>} : memref<5x8x128xf32, #tpu.memory_space<vmem>>, vector<1x8x128xf32>,
    %c1 = arith.constant 1 : index
    %c0_19 = arith.constant 0 : index
    %c0_20 = arith.constant 0 : index
    %21 = vector.load %arg4[%c1, %c0_19, %c0_20] : memref<5x128x128xf32, #tpu.memory_space<vmem>>, vector<1x128x128xf32>
    %22 = vector.shape_cast %21 : vector<1x128x128xf32> to vector<128x128xf32>
    %cst_21 = arith.constant dense<0.000000e+00> : vector<8x128xf32>
    %23 = tpu.matmul %17, %22, %cst_21 {dimension_numbers = #tpu.dot_dimension_numbers<[1], [0], [0], [1], [0, 0, 1, 1], [], []>} : vector<8x128xf32>, vector<128x128xf32>, vector<8x128xf32> -> vector<8x128xf32>
    %c1_22 = arith.constant 1 : index
    %c0_23 = arith.constant 0 : index
    %c0_24 = arith.constant 0 : index
    %24 = vector.load %arg5[%c1_22, %c0_23, %c0_24] : memref<5x1x128xf32, #tpu.memory_space<vmem>>, vector<1x1x128xf32>
    %25 = vector.shape_cast %24 : vector<1x1x128xf32> to vector<1x128xf32>
    %26 = vector.broadcast %25 : vector<1x128xf32> to vector<8x128xf32>
    %27 = arith.addf %23, %26 : vector<8x128xf32>
    %cst_25 = arith.constant 0.000000e+00 : f32
    %28 = vector.broadcast %cst_25 : f32 to vector<8x128xf32>
    %29 = arith.maximumf %27, %28 : vector<8x128xf32>
    %c1_26 = arith.constant 1 : index
    %c0_27 = arith.constant 0 : index
    %c0_28 = arith.constant 0 : index
    %30 = vector.load %arg9[%c1_26, %c0_27, %c0_28] : memref<5x8x128xf32, #tpu.memory_space<vmem>>, vector<1x8x128xf32>
    %31 = vector.shape_cast %30 : vector<1x8x128xf32> to vector<8x128xf32>
    %32 = vector.shape_cast %29 : vector<8x128xf32> to vector<1x8x128xf32>
    tpu.vector_store %arg9[%c1_26, %c0_27, %c0_28], %32 {strides = array<i32>} : memref<5x8x128xf32, #tpu.memory_space<vmem>>, vector<1x8x128xf32>,
    %c2 = arith.constant 2 : index
    %c0_29 = arith.constant 0 : index
    %c0_30 = arith.constant 0 : index
    %33 = vector.load %arg4[%c2, %c0_29, %c0_30] : memref<5x128x128xf32, #tpu.memory_space<vmem>>, vector<1x128x128xf32>
    %34 = vector.shape_cast %33 : vector<1x128x128xf32> to vector<128x128xf32>
    %cst_31 = arith.constant dense<0.000000e+00> : vector<8x128xf32>
    %35 = tpu.matmul %29, %34, %cst_31 {dimension_numbers = #tpu.dot_dimension_numbers<[1], [0], [0], [1], [0, 0, 1, 1], [], []>} : vector<8x128xf32>, vector<128x128xf32>, vector<8x128xf32> -> vector<8x128xf32>
    %c2_32 = arith.constant 2 : index
    %c0_33 = arith.constant 0 : index
    %c0_34 = arith.constant 0 : index
    %36 = vector.load %arg5[%c2_32, %c0_33, %c0_34] : memref<5x1x128xf32, #tpu.memory_space<vmem>>, vector<1x1x128xf32>
    %37 = vector.shape_cast %36 : vector<1x1x128xf32> to vector<1x128xf32>
    %38 = vector.broadcast %37 : vector<1x128xf32> to vector<8x128xf32>
    %39 = arith.addf %35, %38 : vector<8x128xf32>
    %cst_35 = arith.constant 0.000000e+00 : f32
    %40 = vector.broadcast %cst_35 : f32 to vector<8x128xf32>
    %41 = arith.maximumf %39, %40 : vector<8x128xf32>
    %c2_36 = arith.constant 2 : index
    %c0_37 = arith.constant 0 : index
    %c0_38 = arith.constant 0 : index
    %42 = vector.load %arg9[%c2_36, %c0_37, %c0_38] : memref<5x8x128xf32, #tpu.memory_space<vmem>>, vector<1x8x128xf32>
    %43 = vector.shape_cast %42 : vector<1x8x128xf32> to vector<8x128xf32>
    %44 = vector.shape_cast %41 : vector<8x128xf32> to vector<1x8x128xf32>
    tpu.vector_store %arg9[%c2_36, %c0_37, %c0_38], %44 {strides = array<i32>} : memref<5x8x128xf32, #tpu.memory_space<vmem>>, vector<1x8x128xf32>,
    %c3 = arith.constant 3 : index
    %c0_39 = arith.constant 0 : index
    %c0_40 = arith.constant 0 : index
    %45 = vector.load %arg4[%c3, %c0_39, %c0_40] : memref<5x128x128xf32, #tpu.memory_space<vmem>>, vector<1x128x128xf32>
    %46 = vector.shape_cast %45 : vector<1x128x128xf32> to vector<128x128xf32>
    %cst_41 = arith.constant dense<0.000000e+00> : vector<8x128xf32>
    %47 = tpu.matmul %41, %46, %cst_41 {dimension_numbers = #tpu.dot_dimension_numbers<[1], [0], [0], [1], [0, 0, 1, 1], [], []>} : vector<8x128xf32>, vector<128x128xf32>, vector<8x128xf32> -> vector<8x128xf32>
    %c3_42 = arith.constant 3 : index
    %c0_43 = arith.constant 0 : index
    %c0_44 = arith.constant 0 : index
    %48 = vector.load %arg5[%c3_42, %c0_43, %c0_44] : memref<5x1x128xf32, #tpu.memory_space<vmem>>, vector<1x1x128xf32>
    %49 = vector.shape_cast %48 : vector<1x1x128xf32> to vector<1x128xf32>
    %50 = vector.broadcast %49 : vector<1x128xf32> to vector<8x128xf32>
    %51 = arith.addf %47, %50 : vector<8x128xf32>
    %cst_45 = arith.constant 0.000000e+00 : f32
    %52 = vector.broadcast %cst_45 : f32 to vector<8x128xf32>
    %53 = arith.maximumf %51, %52 : vector<8x128xf32>
    %c3_46 = arith.constant 3 : index
    %c0_47 = arith.constant 0 : index
    %c0_48 = arith.constant 0 : index
    %54 = vector.load %arg9[%c3_46, %c0_47, %c0_48] : memref<5x8x128xf32, #tpu.memory_space<vmem>>, vector<1x8x128xf32>
    %55 = vector.shape_cast %54 : vector<1x8x128xf32> to vector<8x128xf32>
    %56 = vector.shape_cast %53 : vector<8x128xf32> to vector<1x8x128xf32>
    tpu.vector_store %arg9[%c3_46, %c0_47, %c0_48], %56 {strides = array<i32>} : memref<5x8x128xf32, #tpu.memory_space<vmem>>, vector<1x8x128xf32>,
    %c4 = arith.constant 4 : index
    %c0_49 = arith.constant 0 : index
    %c0_50 = arith.constant 0 : index
    %57 = vector.load %arg4[%c4, %c0_49, %c0_50] : memref<5x128x128xf32, #tpu.memory_space<vmem>>, vector<1x128x128xf32>
    %58 = vector.shape_cast %57 : vector<1x128x128xf32> to vector<128x128xf32>
    %cst_51 = arith.constant dense<0.000000e+00> : vector<8x128xf32>
    %59 = tpu.matmul %53, %58, %cst_51 {dimension_numbers = #tpu.dot_dimension_numbers<[1], [0], [0], [1], [0, 0, 1, 1], [], []>} : vector<8x128xf32>, vector<128x128xf32>, vector<8x128xf32> -> vector<8x128xf32>
    %c4_52 = arith.constant 4 : index
    %c0_53 = arith.constant 0 : index
    %c0_54 = arith.constant 0 : index
    %60 = vector.load %arg5[%c4_52, %c0_53, %c0_54] : memref<5x1x128xf32, #tpu.memory_space<vmem>>, vector<1x1x128xf32>
    %61 = vector.shape_cast %60 : vector<1x1x128xf32> to vector<1x128xf32>
    %62 = vector.broadcast %61 : vector<1x128xf32> to vector<8x128xf32>
    %63 = arith.addf %59, %62 : vector<8x128xf32>
    %cst_55 = arith.constant 0.000000e+00 : f32
    %64 = vector.broadcast %cst_55 : f32 to vector<8x128xf32>
    %65 = arith.maximumf %63, %64 : vector<8x128xf32>
    %c4_56 = arith.constant 4 : index
    %c0_57 = arith.constant 0 : index
    %c0_58 = arith.constant 0 : index
    %66 = vector.load %arg9[%c4_56, %c0_57, %c0_58] : memref<5x8x128xf32, #tpu.memory_space<vmem>>, vector<1x8x128xf32>
    %67 = vector.shape_cast %66 : vector<1x8x128xf32> to vector<8x128xf32>
    %68 = vector.shape_cast %65 : vector<8x128xf32> to vector<1x8x128xf32>
    tpu.vector_store %arg9[%c4_56, %c0_57, %c0_58], %68 {strides = array<i32>} : memref<5x8x128xf32, #tpu.memory_space<vmem>>, vector<1x8x128xf32>,
    %c0_59 = arith.constant 0 : index
    %c0_60 = arith.constant 0 : index
    %69 = vector.load %arg6[%c0_59, %c0_60] : memref<128x128xf32, #tpu.memory_space<vmem>>, vector<128x128xf32>
    %cst_61 = arith.constant dense<0.000000e+00> : vector<8x128xf32>
    %70 = tpu.matmul %65, %69, %cst_61 {dimension_numbers = #tpu.dot_dimension_numbers<[1], [0], [0], [1], [0, 0, 1, 1], [], []>} : vector<8x128xf32>, vector<128x128xf32>, vector<8x128xf32> -> vector<8x128xf32>
    %c0_62 = arith.constant 0 : index
    %c0_63 = arith.constant 0 : index
    %71 = vector.load %arg7[%c0_62, %c0_63] : memref<1x128xf32, #tpu.memory_space<vmem>>, vector<1x128xf32>
    %72 = vector.broadcast %71 : vector<1x128xf32> to vector<8x128xf32>
    %73 = arith.addf %70, %72 : vector<8x128xf32>
    %cst_64 = arith.constant 0.000000e+00 : f32
    %74 = vector.broadcast %cst_64 : f32 to vector<8x128xf32>
    %75 = arith.maximumf %73, %74 : vector<8x128xf32>
    %c0_65 = arith.constant 0 : index
    %c0_66 = arith.constant 0 : index
    %76 = vector.load %arg10[%c0_65, %c0_66] : memref<8x128xf32, #tpu.memory_space<vmem>>, vector<8x128xf32>
    tpu.vector_store %arg10[%c0_65, %c0_66], %75 {strides = array<i32>} : memref<8x128xf32, #tpu.memory_space<vmem>>, vector<8x128xf32>,
    return
  }
  func.func @transform_0(%arg0: i32) -> (i32, i32) {
    %c0_i32 = arith.constant 0 : i32
    %c0_i32_0 = arith.constant 0 : i32
    return %arg0, %c0_i32 : i32, i32
  }
  func.func @transform_1(%arg0: i32) -> (i32, i32) {
    %c0_i32 = arith.constant 0 : i32
    %c0_i32_0 = arith.constant 0 : i32
    %c0_i32_1 = arith.constant 0 : i32
    return %c0_i32, %c0_i32_0 : i32, i32
  }
  func.func @transform_2(%arg0: i32) -> (i32, i32) {
    %c0_i32 = arith.constant 0 : i32
    %c0_i32_0 = arith.constant 0 : i32
    %c0_i32_1 = arith.constant 0 : i32
    return %c0_i32, %c0_i32_0 : i32, i32
  }
  func.func @transform_3(%arg0: i32) -> (i32, i32, i32) {
    %c0_i32 = arith.constant 0 : i32
    %c0_i32_0 = arith.constant 0 : i32
    %c0_i32_1 = arith.constant 0 : i32
    %c0_i32_2 = arith.constant 0 : i32
    return %c0_i32, %c0_i32_0, %c0_i32_1 : i32, i32, i32
  }
  func.func @transform_4(%arg0: i32) -> (i32, i32, i32) {
    %c0_i32 = arith.constant 0 : i32
    %c0_i32_0 = arith.constant 0 : i32
    %c0_i32_1 = arith.constant 0 : i32
    %c0_i32_2 = arith.constant 0 : i32
    return %c0_i32, %c0_i32_0, %c0_i32_1 : i32, i32, i32
  }
  func.func @transform_5(%arg0: i32) -> (i32, i32) {
    %c0_i32 = arith.constant 0 : i32
    %c0_i32_0 = arith.constant 0 : i32
    %c0_i32_1 = arith.constant 0 : i32
    return %c0_i32, %c0_i32_0 : i32, i32
  }
  func.func @transform_6(%arg0: i32) -> (i32, i32) {
    %c0_i32 = arith.constant 0 : i32
    %c0_i32_0 = arith.constant 0 : i32
    %c0_i32_1 = arith.constant 0 : i32
    return %c0_i32, %c0_i32_0 : i32, i32
  }
  func.func @transform_7(%arg0: i32) -> (i32, i32) {
    %c0_i32 = arith.constant 0 : i32
    %c0_i32_0 = arith.constant 0 : i32
    return %arg0, %c0_i32 : i32, i32
  }
  func.func @transform_8(%arg0: i32) -> (i32, i32, i32) {
    %c0_i32 = arith.constant 0 : i32
    %c0_i32_0 = arith.constant 0 : i32
    %c0_i32_1 = arith.constant 0 : i32
    return %c0_i32, %arg0, %c0_i32_0 : i32, i32, i32
  }
  func.func @transform_9(%arg0: i32) -> (i32, i32) {
    %c0_i32 = arith.constant 0 : i32
    %c0_i32_0 = arith.constant 0 : i32
    return %arg0, %c0_i32 : i32, i32
  }
}

</mosaic_0001>

<bundles_post_ra>
// kernel: tpu_custom_call.1
= control target key start
LH: loop header
LB: loop body
LE: loop exit
PB: predicated region body
PF: predicated region fallthrough
CT: control target
= control target key end

     0   :  { %15 = vsyncpa [#allocation3], 0  ;;  %s2289_s0 = inlined_call_operand.hbm [shape: f32[8,896], index: 0, kind: input, shape index: {}]   ;;  %s2290_s1 = inlined_call_operand.hbm [shape: f32[896,128], index: 1, kind: input, shape index: {}]   ;;  %s2291_s2 = inlined_call_operand.vmem [shape: f32[1,128], index: 2, kind: input, shape index: {}]   ;;  %s2292_s3 = inlined_call_operand.hbm [shape: f32[5,128,128], index: 3, kind: input, shape index: {}]   ;;  %s2293_s4 = inlined_call_operand.vmem [shape: f32[5,1,128], index: 4, kind: input, shape index: {}]   ;;  %s2294_s5 = inlined_call_operand.hbm [shape: f32[128,128], index: 5, kind: input, shape index: {}]   ;;  %s2295_s6 = inlined_call_operand.vmem [shape: f32[1,128], index: 6, kind: input, shape index: {}]   ;;  %s2296_s7 = inlined_call_operand.hbm [shape: f32[8,128], index: 7, kind: output, shape index: {0}]   ;;  %s2297_s8 = inlined_call_operand.hbm [shape: f32[5,8,128], index: 8, kind: output, shape index: {1}]   ;;  %s2298_s9 = inlined_call_operand.hbm [shape: f32[8,128], index: 9, kind: output, shape index: {2}]  }
   0x1   :  { %16 = vsyncpa [#allocation6], 0 }
   0x2   :  { %17 = vsyncpa [#allocation9], 0 }
   0x3   :  { %18 = vsyncpa [#allocation4], 0 }
   0x4   :  { %19 = vsyncpa [#allocation12], 0  ;;  %s2040_s30 = smov [#allocation5]   ;;  %s1876_s13 = scalar_lea.hbm %s2290_s1, 14336 }
   0x5   :  { %s35_s10 = sshll.u32 %s2040_s30, 4  ;;  %p1877_p0 = scmp.ne.s32.totalorder %s2290_s1, %s1876_s13  ;;  %s36_s10 = int_to_ptr.vmem [resolvable:$true] %s35_s10 }
   0x6   :  { %p1880_p1 = scmp.lt.u32.totalorder %s1876_s13, %s2290_s1 }
   0x8   :  { %p1882_p2 = pnand %p1880_p1, %p1877_p0 }
   0xa   :  { %1885 = shalt.err (!%p1882_p2)
}
   0xb   :  { %s1886_s18 = scalar_lea.vmem %s36_s10, 14336  ;;  %p1891_p4 = scmp.lt.s32.totalorder %s36_s10, %s36_s10 }
   0xc   :  { %p1887_p3 = scmp.ne.s32.totalorder %s36_s10, %s1886_s18  ;;  %p1892_p5 = scmp.lt.s32.totalorder %s1886_s18, %s1886_s18 }
   0xe   :  { %p1893_p6 = por %p1892_p5, %p1891_p4 }
  0x10   :  { %p1894_p7 = pnand %p1893_p6, %p1887_p3 }
  0x12   :  { %1897 = shalt.err (!%p1894_p7)
}
  0x13   :  { %s2041_s19 = smov 128   ;;  %s2042_s20 = smov 8  }
  0x14   :  { %41 = dma.hbm_to_vmem [thread:$0]  %s2290_s1, 14336, %s36_s10, [#allocation6], %s2041_s19, %s2041_s19, %s2042_s20  }
  0x15   :  { %s2043_s23 = smov [#allocation2]   ;;  %s2044_s25 = smov [#allocation7]  }
  0x16   :  { %s26_s24 = sshll.u32 %s2043_s23, 4  ;;  %s49_s26 = sshll.u32 %s2044_s25, 4  ;;  %s27_s24 = int_to_ptr.vmem [resolvable:$true] %s26_s24  ;;  %s50_s26 = int_to_ptr.vmem [resolvable:$true] %s49_s26 }
  0x17   :  { %s1898_s29 = scalar_lea.hbm %s2289_s0, 896 }
  0x18   :  { %p1899_p8 = scmp.ne.s32.totalorder %s2289_s0, %s1898_s29  ;;  %p1902_p9 = scmp.lt.u32.totalorder %s1898_s29, %s2289_s0 }
  0x1a   :  { %p1904_p10 = pnand %p1902_p9, %p1899_p8 }
  0x1c   :  { %1907 = shalt.err (!%p1904_p10)
}
  0x1d   :  { %s1908_s1 = scalar_lea.vmem %s27_s24, 896  ;;  %p1913_p12 = scmp.lt.s32.totalorder %s27_s24, %s27_s24 }
  0x1e   :  { %p1909_p11 = scmp.ne.s32.totalorder %s27_s24, %s1908_s1  ;;  %p1914_p13 = scmp.lt.s32.totalorder %s1908_s1, %s1908_s1 }
  0x20   :  { %p1915_p0 = por %p1914_p13, %p1913_p12 }
  0x22   :  { %p1916_p1 = pnand %p1915_p0, %p1909_p11 }
  0x24   :  { %1919 = shalt.err (!%p1916_p1)
}
  0x25   :  { %29 = dma.hbm_to_vmem [thread:$0]  %s2289_s0, 896, %s27_s24, [#allocation3]  }
  0x26   :  { %s1920_s17 = scalar_lea.hbm %s2292_s3, 10240 }
  0x27   :  { %p1921_p2 = scmp.ne.s32.totalorder %s2292_s3, %s1920_s17  ;;  %p1924_p3 = scmp.lt.u32.totalorder %s1920_s17, %s2292_s3 }
  0x29   :  { %p1926_p4 = pnand %p1924_p3, %p1921_p2 }
  0x2b   :  { %1929 = shalt.err (!%p1926_p4)
}
  0x2c   :  { %s1930_s25 = scalar_lea.vmem %s50_s26, 10240  ;;  %p1935_p6 = scmp.lt.s32.totalorder %s50_s26, %s50_s26 }
  0x2d   :  { %p1931_p5 = scmp.ne.s32.totalorder %s50_s26, %s1930_s25  ;;  %p1936_p7 = scmp.lt.s32.totalorder %s1930_s25, %s1930_s25 }
  0x2f   :  { %p1937_p8 = por %p1936_p7, %p1935_p6 }
  0x31   :  { %p1938_p9 = pnand %p1937_p8, %p1931_p5 }
  0x33   :  { %1941 = shalt.err (!%p1938_p9)
}
  0x34   :  { %55 = dma.hbm_to_vmem [thread:$0]  %s2292_s3, 10240, %s50_s26, [#allocation6], %s2041_s19, %s2041_s19, %s2042_s20  }
  0x35   :  { %s2045_s27 = smov [#allocation8]   ;;  %s1942_s11 = scalar_lea.hbm %s2294_s5, 2048 }
  0x36   :  { %s63_s28 = sshll.u32 %s2045_s27, 4  ;;  %p1943_p10 = scmp.ne.s32.totalorder %s2294_s5, %s1942_s11  ;;  %s64_s28 = int_to_ptr.vmem [resolvable:$true] %s63_s28 }
  0x37   :  { %p1946_p11 = scmp.lt.u32.totalorder %s1942_s11, %s2294_s5 }
  0x39   :  { %p1948_p12 = pnand %p1946_p11, %p1943_p10 }
  0x3b   :  { %1951 = shalt.err (!%p1948_p12)
}
  0x3c   :  { %s1952_s14 = scalar_lea.vmem %s64_s28, 2048  ;;  %p1957_p0 = scmp.lt.s32.totalorder %s64_s28, %s64_s28 }
  0x3d   :  { %p1953_p13 = scmp.ne.s32.totalorder %s64_s28, %s1952_s14  ;;  %p1958_p1 = scmp.lt.s32.totalorder %s1952_s14, %s1952_s14 }
  0x3f   :  { %p1959_p2 = por %p1958_p1, %p1957_p0 }
  0x41   :  { %p1960_p3 = pnand %p1959_p2, %p1953_p13 }
  0x43   :  { %1963 = shalt.err (!%p1960_p3)
}
  0x44   :  { %69 = dma.hbm_to_vmem [thread:$0]  %s2294_s5, 2048, %s64_s28, [#allocation9], %s2041_s19, %s2041_s19, %s2042_s20  }
  0x45   :  { %2030 = dma.done.wait [#allocation3], 896  }
  0x46   :  { %2031 = vsyncadd [#allocation3], 4294966400 }
  0x47   :  { %2032 = dma.done.wait [#allocation6], 24576  }
  0x48   :  { %2033 = vsyncadd [#allocation6], 4294942720 }
  0x49   :  { %2034 = dma.done.wait [#allocation9], 2048  }
  0x4a   :  { %2035 = vsyncadd [#allocation9], 4294965248  ;;  %v107_v0 = vld [vmem:[#allocation5 + $0x80] sm:$0xff]  ;;  %v108_v1 = vld [vmem:[#allocation5 + $0x88] sm:$0xff]  ;;  %vm2047_vm0 = vmmov 0   ;;  %s2049_s27 = smov [#allocation11]  }
  0x4b   :  { %v91_v2 = vld [vmem:[#allocation5] sm:$0xff]  ;;  %v1600_v3 = vpack.c.bf16 %v108_v1, %v107_v0  ;;  %v92_v4 = vld [vmem:[#allocation5 + $0x8] sm:$0xff]  ;;  %v109_v11 = vld [vmem:[#allocation5 + $0x90] sm:$0xff]  ;;  %s1089_s28 = sshll.u32 %s2049_s27, 4  ;;  %s2050_s29 = smov [#allocation10]   ;;  %s1090_s28 = int_to_ptr.vmem [resolvable:$true] %s1089_s28 }
  0x4c   :  { %v139_v5 = vld [vmem:[#allocation5 + $0x180] sm:$0xff]  ;;  %v140_v6 = vld [vmem:[#allocation5 + $0x188] sm:$0xff]  ;;  %v1602_v7 = vpack.c.bf16 %v92_v4, %v91_v2  ;;  %v110_v13 = vld [vmem:[#allocation5 + $0x98] sm:$0xff]  ;;  %s1080_s30 = sshll.u32 %s2050_s29, 4  ;;  %s1964_s11 = scalar_lea.vmem %s1090_s28, 640  ;;  %s1081_s30 = int_to_ptr.vmem [resolvable:$true] %s1080_s30 }
  0x4d   :  { %v1632_v8 = vpack.c.bf16 %v140_v6, %v139_v5  ;;  %v123_v9 = vld [vmem:[#allocation5 + $0x100] sm:$0xff]  ;;  %v124_v10 = vld [vmem:[#allocation5 + $0x108] sm:$0xff]  ;;  %1601 = vmatprep.subr.bf16.mxu0 %v1600_v3  ;;  %v93_v14 = vld [vmem:[#allocation5 + $0x10] sm:$0xff]  ;;  %v1604_v16 = vpack.c.bf16 %v110_v13, %v109_v11  ;;  %p1965_p4 = scmp.ne.s32.totalorder %s1090_s28, %s1964_s11  ;;  %p1969_p5 = scmp.lt.s32.totalorder %s1090_s28, %s1090_s28 }
  0x4e   :  { %v1634_v12 = vpack.c.bf16 %v124_v10, %v123_v9  ;;  %v94_v15 = vld [vmem:[#allocation5 + $0x18] sm:$0xff]  ;;  %1603 = vmatpush3.bf16.msra.mxu0 %v1602_v7  ;;  %v141_v18 = vld [vmem:[#allocation5 + $0x190] sm:$0xff]  ;;  %v111_v23 = vld [vmem:[#allocation5 + $0xa0] sm:$0xff]  ;;  %p1970_p6 = scmp.lt.s32.totalorder %s1964_s11, %s1964_s11 }
  0x4f   :  { %1633 = vmatprep.subr.bf16.mxu1 %v1632_v8  ;;  %v1606_v17 = vpack.c.bf16 %v94_v15, %v93_v14  ;;  %v142_v19 = vld [vmem:[#allocation5 + $0x198] sm:$0xff]  ;;  %v125_v20 = vld [vmem:[#allocation5 + $0x110] sm:$0xff]  ;;  %v112_v24 = vld [vmem:[#allocation5 + $0xa8] sm:$0xff]  ;;  %1605 = vmatprep.subr.bf16.mxu0 %v1604_v16 }
  0x50   :  { %1635 = vmatpush3.bf16.msra.mxu1 %v1634_v12  ;;  %v1636_v21 = vpack.c.bf16 %v142_v19, %v141_v18  ;;  %v126_v22 = vld [vmem:[#allocation5 + $0x118] sm:$0xff]  ;;  %v1608_v26 = vpack.c.bf16 %v112_v24, %v111_v23  ;;  %v95_v27 = vld [vmem:[#allocation5 + $0x20] sm:$0xff]  ;;  %v96_v28 = vld [vmem:[#allocation5 + $0x28] sm:$0xff]  ;;  %p1971_p7 = por %p1970_p6, %p1969_p5 }
  0x51   :  { %v1638_v25 = vpack.c.bf16 %v126_v22, %v125_v20  ;;  %v143_v29 = vld [vmem:[#allocation5 + $0x1a0] sm:$0xff]  ;;  %v144_v30 = vld [vmem:[#allocation5 + $0x1a8] sm:$0xff]  ;;  %v1610_v33 = vpack.c.bf16 %v96_v28, %v95_v27  ;;  %v113_v35 = vld [vmem:[#allocation5 + $0xb0] sm:$0xff] }
  0x52   :  { %1637 = vmatprep.subr.bf16.mxu1 %v1636_v21  ;;  %v127_v31 = vld [vmem:[#allocation5 + $0x120] sm:$0xff]  ;;  %v128_v32 = vld [vmem:[#allocation5 + $0x128] sm:$0xff]  ;;  %1607 = vmatpush3.bf16.msra.mxu0 %v1606_v17  ;;  %v1640_v34 = vpack.c.bf16 %v144_v30, %v143_v29  ;;  %v114_v36 = vld [vmem:[#allocation5 + $0xb8] sm:$0xff]  ;;  %p1972_p8 = pnand %p1971_p7, %p1965_p4 }
  0x53   :  { %v97_v37 = vld [vmem:[#allocation5 + $0x30] sm:$0xff]  ;;  %1609 = vmatprep.subr.bf16.mxu0 %v1608_v26  ;;  %v1642_v38 = vpack.c.bf16 %v128_v32, %v127_v31  ;;  %v1612_v39 = vpack.c.bf16 %v114_v36, %v113_v35  ;;  %v98_v40 = vld [vmem:[#allocation5 + $0x38] sm:$0xff]  ;;  %v115_v46 = vld [vmem:[#allocation5 + $0xc0] sm:$0xff] }
  0x54   :  { %1639 = vmatpush3.bf16.msra.mxu1 %v1638_v25  ;;  %v145_v41 = vld [vmem:[#allocation5 + $0x1b0] sm:$0xff]  ;;  %v146_v42 = vld [vmem:[#allocation5 + $0x1b8] sm:$0xff]  ;;  %v116_v47 = vld [vmem:[#allocation5 + $0xc8] sm:$0xff]  ;;  %v1614_v48 = vpack.c.bf16 %v98_v40, %v97_v37 }
  0x55   :  { %1641 = vmatprep.subr.bf16.mxu1 %v1640_v34  ;;  %v1644_v43 = vpack.c.bf16 %v146_v42, %v145_v41  ;;  %v129_v44 = vld [vmem:[#allocation5 + $0x130] sm:$0xff]  ;;  %v130_v45 = vld [vmem:[#allocation5 + $0x138] sm:$0xff]  ;;  %v147_v49 = vld [vmem:[#allocation5 + $0x1c0] sm:$0xff]  ;;  %v1616_v52 = vpack.c.bf16 %v116_v47, %v115_v46 }
  0x56   :  { %1611 = vmatpush3.bf16.msra.mxu0 %v1610_v33  ;;  %v148_v50 = vld [vmem:[#allocation5 + $0x1c8] sm:$0xff]  ;;  %v1646_v51 = vpack.c.bf16 %v130_v45, %v129_v44  ;;  %v99_v53 = vld [vmem:[#allocation5 + $0x40] sm:$0xff]  ;;  %v117_v58 = vld [vmem:[#allocation5 + $0xd0] sm:$0xff] }
  0x57   :  { %1613 = vmatprep.subr.bf16.mxu0 %v1612_v39  ;;  %v100_v54 = vld [vmem:[#allocation5 + $0x48] sm:$0xff]  ;;  %v131_v55 = vld [vmem:[#allocation5 + $0x140] sm:$0xff]  ;;  %v1648_v56 = vpack.c.bf16 %v148_v50, %v147_v49  ;;  %v118_v59 = vld [vmem:[#allocation5 + $0xd8] sm:$0xff] }
  0x58   :  { %1643 = vmatpush3.bf16.msra.mxu1 %v1642_v38  ;;  %v132_v57 = vld [vmem:[#allocation5 + $0x148] sm:$0xff]  ;;  %v149_v60 = vld [vmem:[#allocation5 + $0x1d0] sm:$0xff]  ;;  %v150_v61 = vld [vmem:[#allocation5 + $0x1d8] sm:$0xff]  ;;  %v1618_v62 = vpack.c.bf16 %v100_v54, %v99_v53  ;;  %v1620_v0 = vpack.c.bf16 %v118_v59, %v117_v58 }
  0x59   :  { %1645 = vmatprep.subr.bf16.mxu1 %v1644_v43  ;;  %v1650_v63 = vpack.c.bf16 %v132_v57, %v131_v55  ;;  %v101_v1 = vld [vmem:[#allocation5 + $0x50] sm:$0xff]  ;;  %v102_v2 = vld [vmem:[#allocation5 + $0x58] sm:$0xff]  ;;  %v1652_v4 = vpack.c.bf16 %v150_v61, %v149_v60  ;;  %v119_v6 = vld [vmem:[#allocation5 + $0xe0] sm:$0xff] }
  0x5a   :  { %1615 = vmatpush3.bf16.msra.mxu0 %v1614_v48  ;;  %v133_v3 = vld [vmem:[#allocation5 + $0x150] sm:$0xff]  ;;  %v134_v5 = vld [vmem:[#allocation5 + $0x158] sm:$0xff]  ;;  %v120_v7 = vld [vmem:[#allocation5 + $0xe8] sm:$0xff]  ;;  %v1622_v10 = vpack.c.bf16 %v102_v2, %v101_v1  ;;  %v2048_v1 = vmov 0.0  }
  0x5b   :  { %1617 = vmatprep.subr.bf16.mxu0 %v1616_v52  ;;  %v151_v8 = vld [vmem:[#allocation5 + $0x1e0] sm:$0xff]  ;;  %v152_v9 = vld [vmem:[#allocation5 + $0x1e8] sm:$0xff]  ;;  %v85_v12 = vld [vmem:[#allocation2 + $0x8] sm:$0xff]  ;;  %v1654_v13 = vpack.c.bf16 %v134_v5, %v133_v3  ;;  %v1624_v14 = vpack.c.bf16 %v120_v7, %v119_v6 }
  0x5c   :  { %1647 = vmatpush3.bf16.msra.mxu1 %v1646_v51  ;;  %v103_v11 = vld [vmem:[#allocation5 + $0x60] sm:$0xff]  ;;  %v104_v15 = vld [vmem:[#allocation5 + $0x68] sm:$0xff]  ;;  %v1656_v18 = vpack.c.bf16 %v152_v9, %v151_v8  ;;  %v121_v19 = vld [vmem:[#allocation5 + $0xf0] sm:$0xff]  ;;  %274 = vmatprep.mubr.f32.mxu0 %v85_v12  ;;  %v2046_v51 = vmov 0.0|0.0  }
  0x5d   :  { %1649 = vmatprep.subr.bf16.mxu1 %v1648_v56  ;;  %v135_v16 = vld [vmem:[#allocation5 + $0x160] sm:$0xff]  ;;  %v136_v17 = vld [vmem:[#allocation5 + $0x168] sm:$0xff]  ;;  %v122_v20 = vld [vmem:[#allocation5 + $0xf8] sm:$0xff]  ;;  %v1626_v24 = vpack.c.bf16 %v104_v15, %v103_v11 }
  0x5e   :  { %1619 = vmatpush3.bf16.msra.mxu0 %v1618_v62  ;;  %v87_v21 = vld [vmem:[#allocation2 + $0x18] sm:$0xff]  ;;  %v153_v22 = vld [vmem:[#allocation5 + $0x1f0] sm:$0xff]  ;;  %v154_v23 = vld [vmem:[#allocation5 + $0x1f8] sm:$0xff]  ;;  %v1658_v25 = vpack.c.bf16 %v136_v17, %v135_v16  ;;  %v1628_v26 = vpack.c.bf16 %v122_v20, %v121_v19 }
  0x5f   :  { %1621 = vmatprep.subr.bf16.mxu0 %v1620_v0  ;;  %344 = vmatprep.mubr.f32.mxu1 %v87_v21  ;;  %v105_v27 = vld [vmem:[#allocation5 + $0x70] sm:$0xff]  ;;  %v106_v28 = vld [vmem:[#allocation5 + $0x78] sm:$0xff]  ;;  %v1660_v30 = vpack.c.bf16 %v154_v23, %v153_v22  ;;  %v171_v32 = vld [vmem:[#allocation5 + $0x280] sm:$0xff] }
  0x60   :  { %1651 = vmatpush3.bf16.msra.mxu1 %v1650_v63  ;;  %v137_v29 = vld [vmem:[#allocation5 + $0x170] sm:$0xff]  ;;  %v138_v31 = vld [vmem:[#allocation5 + $0x178] sm:$0xff]  ;;  %v172_v33 = vld [vmem:[#allocation5 + $0x288] sm:$0xff]  ;;  %v1630_v34 = vpack.c.bf16 %v106_v28, %v105_v27 }
  0x61   :  { %1653 = vmatprep.subr.bf16.mxu1 %v1652_v4  ;;  %v1662_v35 = vpack.c.bf16 %v138_v31, %v137_v29  ;;  %v1664_v36 = vpack.c.bf16 %v172_v33, %v171_v32  ;;  %v155_v37 = vld [vmem:[#allocation5 + $0x200] sm:$0xff]  ;;  %v156_v38 = vld [vmem:[#allocation5 + $0x208] sm:$0xff]  ;;  %v173_v39 = vld [vmem:[#allocation5 + $0x290] sm:$0xff] }
  0x62   :  { %1623 = vmatpush3.bf16.msra.mxu0 %v1622_v10  ;;  %v174_v40 = vld [vmem:[#allocation5 + $0x298] sm:$0xff]  ;;  %v187_v41 = vld [vmem:[#allocation5 + $0x300] sm:$0xff]  ;;  %v188_v42 = vld [vmem:[#allocation5 + $0x308] sm:$0xff]  ;;  %v1666_v44 = vpack.c.bf16 %v156_v38, %v155_v37 }
  0x63   :  { %1625 = vmatprep.subr.bf16.mxu0 %v1624_v14  ;;  %v84_v43 = vld [vmem:[#allocation2] sm:$0xff]  ;;  %v86_v45 = vld [vmem:[#allocation2 + $0x10] sm:$0xff]  ;;  %v1668_v46 = vpack.c.bf16 %v174_v40, %v173_v39  ;;  %v157_v47 = vld [vmem:[#allocation5 + $0x210] sm:$0xff]  ;;  %v1697_v49 = vpack.c.bf16 %v188_v42, %v187_v41 }
  0x64   :  { %1655 = vmatpush3.bf16.msra.mxu1 %v1654_v13  ;;  %v158_v48 = vld [vmem:[#allocation5 + $0x218] sm:$0xff]  ;;  %v175_v50 = vld [vmem:[#allocation5 + $0x2a0] sm:$0xff]  ;;  %v176_v52 = vld [vmem:[#allocation5 + $0x2a8] sm:$0xff] }
  0x65   :  { %1657 = vmatprep.subr.bf16.mxu1 %v1656_v18  ;;  %v189_v53 = vld [vmem:[#allocation5 + $0x310] sm:$0xff]  ;;  %v190_v54 = vld [vmem:[#allocation5 + $0x318] sm:$0xff]  ;;  %v1670_v55 = vpack.c.bf16 %v158_v48, %v157_v47  ;;  %v159_v56 = vld [vmem:[#allocation5 + $0x220] sm:$0xff]  ;;  %v1672_v57 = vpack.c.bf16 %v176_v52, %v175_v50 }
  0x66   :  { %1627 = vmatpush3.bf16.msra.mxu0 %v1626_v24  ;;  %v160_v58 = vld [vmem:[#allocation5 + $0x228] sm:$0xff]  ;;  %v1700_v59 = vpack.c.bf16 %v190_v54, %v189_v53  ;;  %v177_v60 = vld [vmem:[#allocation5 + $0x2b0] sm:$0xff]  ;;  %v178_v61 = vld [vmem:[#allocation5 + $0x2b8] sm:$0xff] }
  0x67   :  { %1629 = vmatprep.subr.bf16.mxu0 %v1628_v26  ;;  %v191_v62 = vld [vmem:[#allocation5 + $0x320] sm:$0xff]  ;;  %v192_v63 = vld [vmem:[#allocation5 + $0x328] sm:$0xff]  ;;  %v89_v0 = vld [vmem:[#allocation2 + $0x28] sm:$0xff]  ;;  %v1674_v2 = vpack.c.bf16 %v160_v58, %v159_v56  ;;  %v1676_v3 = vpack.c.bf16 %v178_v61, %v177_v60 }
  0x68   :  { %1659 = vmatpush3.bf16.msra.mxu1 %v1658_v25  ;;  %v161_v4 = vld [vmem:[#allocation5 + $0x230] sm:$0xff]  ;;  %v162_v5 = vld [vmem:[#allocation5 + $0x238] sm:$0xff]  ;;  %v1703_v6 = vpack.c.bf16 %v192_v63, %v191_v62  ;;  %v179_v7 = vld [vmem:[#allocation5 + $0x2c0] sm:$0xff] }
  0x69   :  { %1661 = vmatprep.subr.bf16.mxu1 %v1660_v30  ;;  %v180_v8 = vld [vmem:[#allocation5 + $0x2c8] sm:$0xff]  ;;  %v193_v9 = vld [vmem:[#allocation5 + $0x330] sm:$0xff]  ;;  %v194_v10 = vld [vmem:[#allocation5 + $0x338] sm:$0xff]  ;;  %v1678_v11 = vpack.c.bf16 %v162_v5, %v161_v4 }
  0x6a   :  { %1631 = vmatpush3.bf16.msra.mxu0 %v1630_v34  ;;  %v1680_v12 = vpack.c.bf16 %v180_v8, %v179_v7  ;;  %v163_v13 = vld [vmem:[#allocation5 + $0x240] sm:$0xff]  ;;  %v164_v14 = vld [vmem:[#allocation5 + $0x248] sm:$0xff]  ;;  %v1706_v15 = vpack.c.bf16 %v194_v10, %v193_v9  ;;  %v181_v16 = vld [vmem:[#allocation5 + $0x2d0] sm:$0xff] }
  0x6b   :  { %1665 = vmatprep.subr.bf16.mxu0 %v1664_v36  ;;  %v182_v17 = vld [vmem:[#allocation5 + $0x2d8] sm:$0xff]  ;;  %v195_v18 = vld [vmem:[#allocation5 + $0x340] sm:$0xff]  ;;  %v196_v19 = vld [vmem:[#allocation5 + $0x348] sm:$0xff]  ;;  %v1682_v20 = vpack.c.bf16 %v164_v14, %v163_v13 }
  0x6c   :  { %1663 = vmatpush3.bf16.msra.mxu1 %v1662_v35  ;;  %v1684_v21 = vpack.c.bf16 %v182_v17, %v181_v16  ;;  %v165_v22 = vld [vmem:[#allocation5 + $0x250] sm:$0xff]  ;;  %v166_v23 = vld [vmem:[#allocation5 + $0x258] sm:$0xff]  ;;  %v1709_v24 = vpack.c.bf16 %v196_v19, %v195_v18  ;;  %v183_v25 = vld [vmem:[#allocation5 + $0x2e0] sm:$0xff] }
  0x6d   :  { %1696 = vmatprep.subr.bf16.mxu1 %v2046_v51  ;;  %275 = vmatmul.mubr.f32.vlgmr.msra.gmra.mrb[0].mxu0 %v84_v43  ;;  %v184_v26 = vld [vmem:[#allocation5 + $0x2e8] sm:$0xff]  ;;  %v197_v27 = vld [vmem:[#allocation5 + $0x350] sm:$0xff]  ;;  %v198_v28 = vld [vmem:[#allocation5 + $0x358] sm:$0xff]  ;;  %v1686_v29 = vpack.c.bf16 %v166_v23, %v165_v22 }
  0x6e   :  { %1667 = vmatpush3.bf16.msra.mxu0 %v1666_v44  ;;  %414 = vmatprep.mubr.f32.mxu0 %v89_v0  ;;  %v1688_v30 = vpack.c.bf16 %v184_v26, %v183_v25  ;;  %v167_v31 = vld [vmem:[#allocation5 + $0x260] sm:$0xff]  ;;  %v168_v32 = vld [vmem:[#allocation5 + $0x268] sm:$0xff]  ;;  %v1712_v33 = vpack.c.bf16 %v198_v28, %v197_v27  ;;  %v185_v34 = vld [vmem:[#allocation5 + $0x2f0] sm:$0xff] }
  0x6f   :  { %345 = vmatmul.mubr.f32.vlgmr.msra.gmra.mrb[0].mxu1 %v86_v45  ;;  %1669 = vmatprep.subr.bf16.mxu0 %v1668_v46  ;;  %v186_v35 = vld [vmem:[#allocation5 + $0x2f8] sm:$0xff]  ;;  %v199_v36 = vld [vmem:[#allocation5 + $0x360] sm:$0xff]  ;;  %v200_v37 = vld [vmem:[#allocation5 + $0x368] sm:$0xff]  ;;  %v1690_v38 = vpack.c.bf16 %v168_v32, %v167_v31 }
  0x70   :  { %1698 = vmatpush3.bf16.msra.mxu1 %v1697_v49  ;;  %1387 = vmatprep.mubr.msk.f32.mxu1 %vm2047_vm0, %v2048_v1  ;;  %v1692_v39 = vpack.c.bf16 %v186_v35, %v185_v34  ;;  %v169_v40 = vld [vmem:[#allocation5 + $0x270] sm:$0xff]  ;;  %v170_v41 = vld [vmem:[#allocation5 + $0x278] sm:$0xff]  ;;  %v1715_v42 = vpack.c.bf16 %v200_v37, %v199_v36  ;;  %v88_v47 = vld [vmem:[#allocation2 + $0x20] sm:$0xff] }
  0x71   :  { %1699 = vmatprep.subr.bf16.mxu1 %v2046_v51  ;;  %v201_v43 = vld [vmem:[#allocation5 + $0x370] sm:$0xff]  ;;  %v202_v44 = vld [vmem:[#allocation5 + $0x378] sm:$0xff]  ;;  %v1694_v45 = vpack.c.bf16 %v170_v41, %v169_v40  ;;  %v492_v49 = vld [vmem:[#allocation7] sm:$0xff] }
  0x72   :  { %1671 = vmatpush3.bf16.msra.mxu0 %v1670_v55  ;;  %v1718_v46 = vpack.c.bf16 %v202_v44, %v201_v43  ;;  %v90_v48 = vld [vmem:[#allocation2 + $0x30] sm:$0xff]  ;;  %v493_v50 = vld [vmem:[#allocation7 + $0x8] sm:$0xff]  ;;  %v494_v52 = vld [vmem:[#allocation7 + $0x10] sm:$0xff] }
  0x73   :  { %1673 = vmatprep.subr.bf16.mxu0 %v1672_v57  ;;  %v1721_v53 = vpack.c.bf16 %v493_v50, %v492_v49  ;;  %v495_v54 = vld [vmem:[#allocation7 + $0x18] sm:$0xff]  ;;  %v496_v56 = vld [vmem:[#allocation7 + $0x20] sm:$0xff]  ;;  %v497_v57 = vld [vmem:[#allocation7 + $0x28] sm:$0xff] }
  0x74   :  { %1701 = vmatpush3.bf16.msra.mxu1 %v1700_v59  ;;  %v1724_v55 = vpack.c.bf16 %v495_v54, %v494_v52  ;;  %v1727_v58 = vpack.c.bf16 %v497_v57, %v496_v56  ;;  %v498_v59 = vld [vmem:[#allocation7 + $0x30] sm:$0xff]  ;;  %v499_v60 = vld [vmem:[#allocation7 + $0x38] sm:$0xff]  ;;  %v500_v62 = vld [vmem:[#allocation7 + $0x40] sm:$0xff] }
  0x75   :  { %1702 = vmatprep.subr.bf16.mxu1 %v2046_v51  ;;  %v1730_v61 = vpack.c.bf16 %v499_v60, %v498_v59  ;;  %v501_v63 = vld [vmem:[#allocation7 + $0x48] sm:$0xff]  ;;  %v504_v5 = vld [vmem:[#allocation7 + $0x60] sm:$0xff]  ;;  %v506_v8 = vld [vmem:[#allocation7 + $0x70] sm:$0xff] }
  0x76   :  { %1675 = vmatpush3.bf16.msra.mxu0 %v1674_v2  ;;  %v1733_v0 = vpack.c.bf16 %v501_v63, %v500_v62  ;;  %v502_v2 = vld [vmem:[#allocation7 + $0x50] sm:$0xff]  ;;  %v507_v9 = vld [vmem:[#allocation7 + $0x78] sm:$0xff]  ;;  %v592_v17 = vld [vmem:[#allocation7 + $0xa0] sm:$0xff] }
  0x77   :  { %1677 = vmatprep.subr.bf16.mxu0 %v1676_v3  ;;  %v503_v3 = vld [vmem:[#allocation7 + $0x58] sm:$0xff]  ;;  %v1742_v10 = vpack.c.bf16 %v507_v9, %v506_v8  ;;  %v590_v13 = vld [vmem:[#allocation7 + $0x90] sm:$0xff]  ;;  %v593_v18 = vld [vmem:[#allocation7 + $0xa8] sm:$0xff] }
  0x78   :  { %1704 = vmatpush3.bf16.msra.mxu1 %v1703_v6  ;;  %v1736_v4 = vpack.c.bf16 %v503_v3, %v502_v2  ;;  %v505_v6 = vld [vmem:[#allocation7 + $0x68] sm:$0xff]  ;;  %v1751_v19 = vpack.c.bf16 %v593_v18, %v592_v17  ;;  %v596_v23 = vld [vmem:[#allocation7 + $0xc0] sm:$0xff]  ;;  %v598_v26 = vld [vmem:[#allocation7 + $0xd0] sm:$0xff] }
  0x79   :  { %1705 = vmatprep.subr.bf16.mxu1 %v2046_v51  ;;  %v1739_v7 = vpack.c.bf16 %v505_v6, %v504_v5  ;;  %v599_v27 = vld [vmem:[#allocation7 + $0xd8] sm:$0xff]  ;;  %v602_v49 = vld [vmem:[#allocation7 + $0xf0] sm:$0xff]  ;;  %v687_v54 = vld [vmem:[#allocation7 + $0x108] sm:$0xff] }
  0x7a   :  { %1679 = vmatpush3.bf16.msra.mxu0 %v1678_v11  ;;  %v588_v11 = vld [vmem:[#allocation7 + $0x80] sm:$0xff]  ;;  %v1760_v28 = vpack.c.bf16 %v599_v27, %v598_v26  ;;  %v603_v50 = vld [vmem:[#allocation7 + $0xf8] sm:$0xff]  ;;  %v691_v60 = vld [vmem:[#allocation7 + $0x128] sm:$0xff] }
  0x7b   :  { %1681 = vmatprep.subr.bf16.mxu0 %v1680_v12  ;;  %v589_v12 = vld [vmem:[#allocation7 + $0x88] sm:$0xff]  ;;  %v1766_v52 = vpack.c.bf16 %v603_v50, %v602_v49  ;;  %v689_v57 = vld [vmem:[#allocation7 + $0x118] sm:$0xff]  ;;  %v690_v59 = vld [vmem:[#allocation7 + $0x120] sm:$0xff] }
  0x7c   :  { %1707 = vmatpush3.bf16.msra.mxu1 %v1706_v15  ;;  %v1745_v14 = vpack.c.bf16 %v589_v12, %v588_v11  ;;  %v591_v15 = vld [vmem:[#allocation7 + $0x98] sm:$0xff]  ;;  %v692_v62 = vld [vmem:[#allocation7 + $0x130] sm:$0xff]  ;;  %v694_v2 = vld [vmem:[#allocation7 + $0x140] sm:$0xff] }
  0x7d   :  { %1708 = vmatprep.subr.bf16.mxu1 %v2046_v51  ;;  %v1748_v16 = vpack.c.bf16 %v591_v15, %v590_v13  ;;  %v693_v63 = vld [vmem:[#allocation7 + $0x138] sm:$0xff]  ;;  %v695_v3 = vld [vmem:[#allocation7 + $0x148] sm:$0xff]  ;;  %v696_v5 = vld [vmem:[#allocation7 + $0x150] sm:$0xff] }
  0x7e   :  { %1683 = vmatpush3.bf16.msra.mxu0 %v1682_v20  ;;  %v594_v20 = vld [vmem:[#allocation7 + $0xb0] sm:$0xff]  ;;  %v697_v6 = vld [vmem:[#allocation7 + $0x158] sm:$0xff]  ;;  %v698_v8 = vld [vmem:[#allocation7 + $0x160] sm:$0xff] }
  0x7f   :  { %1685 = vmatprep.subr.bf16.mxu0 %v1684_v21  ;;  %v595_v21 = vld [vmem:[#allocation7 + $0xb8] sm:$0xff]  ;;  %v699_v9 = vld [vmem:[#allocation7 + $0x168] sm:$0xff]  ;;  %v884_v50 = vld [vmem:[#allocation7 + $0x210] sm:$0xff] }
  0x80   :  { %1710 = vmatpush3.bf16.msra.mxu1 %v1709_v24  ;;  %v1754_v22 = vpack.c.bf16 %v595_v21, %v594_v20  ;;  %v597_v24 = vld [vmem:[#allocation7 + $0xc8] sm:$0xff]  ;;  %v701_v17 = vld [vmem:[#allocation7 + $0x178] sm:$0xff]  ;;  %v786_v21 = vld [vmem:[#allocation7 + $0x190] sm:$0xff] }
  0x81   :  { %1711 = vmatprep.subr.bf16.mxu1 %v2046_v51  ;;  %v1757_v25 = vpack.c.bf16 %v597_v24, %v596_v23  ;;  %v1121_v11 = vld [vmem:[%s2293_s4] ss:$0 sm:$0xff]  ;;  %v787_v23 = vld [vmem:[#allocation7 + $0x198] sm:$0xff] }
  0x82   :  { %1687 = vmatpush3.bf16.msra.mxu0 %v1686_v29  ;;  %v600_v29 = vld [vmem:[#allocation7 + $0xe0] sm:$0xff]  ;;  %v785_v20 = vld [vmem:[#allocation7 + $0x188] sm:$0xff]  ;;  %v1796_v24 = vpack.c.bf16 %v787_v23, %v786_v21 }
  0x83   :  { %1689 = vmatprep.subr.bf16.mxu0 %v1688_v30  ;;  %v601_v30 = vld [vmem:[#allocation7 + $0xe8] sm:$0xff]  ;;  %v983_v21 = vld [vmem:[#allocation8 + $0x20] sm:$0xff] }
  0x84   :  { %1713 = vmatpush3.bf16.msra.mxu1 %v1712_v33  ;;  %v1763_v31 = vpack.c.bf16 %v601_v30, %v600_v29  ;;  %v1120_v33 = vld [vmem:[%s2291_s2] ss:$0 sm:$0xff]  ;;  %v791_v29 = vld [vmem:[#allocation7 + $0x1b8] sm:$0xff] }
  0x85   :  { %1714 = vmatprep.subr.bf16.mxu1 %v2046_v51  ;;  %v789_v26 = vld [vmem:[#allocation7 + $0x1a8] sm:$0xff] }
  0x86   :  { %1691 = vmatpush3.bf16.msra.mxu0 %v1690_v38  ;;  %v883_v49 = vld [vmem:[#allocation7 + $0x208] sm:$0xff] }
  0x87   :  { %1693 = vmatprep.subr.bf16.mxu0 %v1692_v39 }
  0x88   :  { %1716 = vmatpush3.bf16.msra.mxu1 %v1715_v42 }
  0x89   :  { %1717 = vmatprep.subr.bf16.mxu1 %v2046_v51 }
  0x8a   :  { %1695 = vmatpush3.bf16.msra.mxu0 %v1694_v45 }
  0x8b   :  { %1720 = vmatprep.subr.bf16.mxu0 %v2046_v51 }
  0x8c   :  { %1719 = vmatpush3.bf16.msra.mxu1 %v1718_v46 }
  0x8d   :  { %1744 = vmatprep.subr.bf16.mxu1 %v2046_v51  ;;  %415 = vmatmul.mubr.f32.vlgmr.msra.gmra.mrb[2].mxu0 %v88_v47 }
  0x8e   :  { %1422 = vmatprep.mubr.msk.f32.mxu0 %vm2047_vm0, %v2048_v1  ;;  %1722 = vmatpush3.bf16.msra.mxu0 %v1721_v53  ;;  %v686_v53 = vld [vmem:[#allocation7 + $0x100] sm:$0xff] }
  0x8f   :  { %1388 = vmatmul.mubr.f32.vlgmr.msra.gmra.mrb[2].mxu1 %v90_v48  ;;  %1723 = vmatprep.subr.bf16.mxu0 %v2046_v51  ;;  %v1769_v56 = vpack.c.bf16 %v687_v54, %v686_v53  ;;  %v885_v53 = vld [vmem:[#allocation7 + $0x218] sm:$0xff] }
  0x90   :  { %1457 = vmatprep.mubr.msk.f32.mxu1 %vm2047_vm0, %v2048_v1  ;;  %1746 = vmatpush3.bf16.msra.mxu1 %v1745_v14  ;;  %v1820_v54 = vpack.c.bf16 %v885_v53, %v884_v50 }
  0x91   :  { %1747 = vmatprep.subr.bf16.mxu1 %v2046_v51 }
  0x92   :  { %1725 = vmatpush3.bf16.msra.mxu0 %v1724_v55  ;;  %v688_v55 = vld [vmem:[#allocation7 + $0x110] sm:$0xff] }
  0x93   :  { %1726 = vmatprep.subr.bf16.mxu0 %v2046_v51 }
  0x94   :  { %1749 = vmatpush3.bf16.msra.mxu1 %v1748_v16  ;;  %v700_v16 = vld [vmem:[#allocation7 + $0x170] sm:$0xff] }
  0x95   :  { %1750 = vmatprep.subr.bf16.mxu1 %v2046_v51  ;;  %v1790_v18 = vpack.c.bf16 %v701_v17, %v700_v16  ;;  %v980_v16 = vld [vmem:[#allocation8 + $0x8] sm:$0xff]  ;;  %v981_v17 = vld [vmem:[#allocation8 + $0x10] sm:$0xff] }
  0x96   :  { %1728 = vmatpush3.bf16.msra.mxu0 %v1727_v58  ;;  %v1772_v58 = vpack.c.bf16 %v689_v57, %v688_v55  ;;  %v886_v55 = vld [vmem:[#allocation7 + $0x220] sm:$0xff] }
  0x97   :  { %1729 = vmatprep.subr.bf16.mxu0 %v2046_v51 }
  0x98   :  { %1752 = vmatpush3.bf16.msra.mxu1 %v1751_v19  ;;  %v784_v19 = vld [vmem:[#allocation7 + $0x180] sm:$0xff] }
  0x99   :  { %1753 = vmatprep.subr.bf16.mxu1 %v2046_v51 }
  0x9a   :  { %1731 = vmatpush3.bf16.msra.mxu0 %v1730_v61  ;;  %v1775_v61 = vpack.c.bf16 %v691_v60, %v690_v59  ;;  %v889_v59 = vld [vmem:[#allocation7 + $0x238] sm:$0xff] }
  0x9b   :  { %1732 = vmatprep.subr.bf16.mxu0 %v2046_v51 }
  0x9c   :  { %1755 = vmatpush3.bf16.msra.mxu1 %v1754_v22  ;;  %v1793_v22 = vpack.c.bf16 %v785_v20, %v784_v19  ;;  %v982_v19 = vld [vmem:[#allocation8 + $0x18] sm:$0xff] }
  0x9d   :  { %1756 = vmatprep.subr.bf16.mxu1 %v2046_v51  ;;  %v1844_v20 = vpack.c.bf16 %v982_v19, %v981_v17 }
  0x9e   :  { %1734 = vmatpush3.bf16.msra.mxu0 %v1733_v0  ;;  %v1778_v0 = vpack.c.bf16 %v693_v63, %v692_v62  ;;  %v891_v62 = vld [vmem:[#allocation7 + $0x248] sm:$0xff] }
  0x9f   :  { %1735 = vmatprep.subr.bf16.mxu0 %v2046_v51 }
  0xa0   :  { %1758 = vmatpush3.bf16.msra.mxu1 %v1757_v25  ;;  %v788_v25 = vld [vmem:[#allocation7 + $0x1a0] sm:$0xff] }
  0xa1   :  { %1759 = vmatprep.subr.bf16.mxu1 %v2046_v51  ;;  %v1799_v27 = vpack.c.bf16 %v789_v26, %v788_v25  ;;  %v987_v26 = vld [vmem:[#allocation8 + $0x40] sm:$0xff] }
  0xa2   :  { %1737 = vmatpush3.bf16.msra.mxu0 %v1736_v4  ;;  %v1781_v4 = vpack.c.bf16 %v695_v3, %v694_v2  ;;  %v893_v2 = vld [vmem:[#allocation7 + $0x258] sm:$0xff] }
  0xa3   :  { %1738 = vmatprep.subr.bf16.mxu0 %v2046_v51 }
  0xa4   :  { %1761 = vmatpush3.bf16.msra.mxu1 %v1760_v28  ;;  %v790_v28 = vld [vmem:[#allocation7 + $0x1b0] sm:$0xff] }
  0xa5   :  { %1762 = vmatprep.subr.bf16.mxu1 %v2046_v51  ;;  %v1802_v30 = vpack.c.bf16 %v791_v29, %v790_v28  ;;  %v989_v29 = vld [vmem:[#allocation8 + $0x50] sm:$0xff] }
  0xa6   :  { %1740 = vmatpush3.bf16.msra.mxu0 %v1739_v7  ;;  %v1784_v7 = vpack.c.bf16 %v697_v6, %v696_v5  ;;  %v895_v5 = vld [vmem:[#allocation7 + $0x268] sm:$0xff] }
  0xa7   :  { %1741 = vmatprep.subr.bf16.mxu0 %v2046_v51 }
  0xa8   :  { %1764 = vmatpush3.bf16.msra.mxu1 %v1763_v31  ;;  %v792_v31 = vld [vmem:[#allocation7 + $0x1c0] sm:$0xff] }
  0xa9   :  { %1765 = vmatprep.subr.bf16.mxu1 %v2046_v51 }
  0xaa   :  { %1743 = vmatpush3.bf16.msra.mxu0 %v1742_v10  ;;  %v1787_v10 = vpack.c.bf16 %v699_v9, %v698_v8 }
  0xab   :  { %1768 = vmatprep.subr.bf16.mxu0 %v2046_v51 }
  0xac   :  { %1767 = vmatpush3.bf16.msra.mxu1 %v1766_v52 }
  0xad   :  { %1792 = vmatprep.subr.bf16.mxu1 %v2046_v51 }
 0x140   :  { %v1163_v32 = vpop.f32.mrb[0].mxu0 }
 0x141   :  { %v1164_v34 = vpop.f32.mrb[1].mxu0 }
 0x142   :  { %v1198_v35 = vpop.f32.mrb[0].mxu1  ;;  %v1165_v36 = vadd.f32 %v1164_v34, %v1163_v32  ;;  %v793_v32 = vld [vmem:[#allocation7 + $0x1c8] sm:$0xff]  ;;  %v794_v34 = vld [vmem:[#allocation7 + $0x1d0] sm:$0xff] }
 0x143   :  { %v1199_v37 = vpop.f32.mrb[1].mxu1 }
 0x144   :  { %v1200_v38 = vadd.f32 %v1199_v37, %v1198_v35  ;;  %v277_v39 = vadd.f32 %v1165_v36, %v1120_v33  ;;  %v1805_v33 = vpack.c.bf16 %v793_v32, %v792_v31  ;;  %v795_v35 = vld [vmem:[#allocation7 + $0x1d8] sm:$0xff]  ;;  %v796_v37 = vld [vmem:[#allocation7 + $0x1e0] sm:$0xff] }
 0x145   :  { %v1808_v36 = vpack.c.bf16 %v795_v35, %v794_v34  ;;  %v991_v32 = vld [vmem:[#allocation8 + $0x60] sm:$0xff]  ;;  %v1127_v35 = vld [vmem:[%s2293_s4 + $0x3] ss:$0 sm:$0xff] }
 0x146   :  { %v347_v40 = vadd.f32 %v1200_v38, %v277_v39  ;;  %v797_v38 = vld [vmem:[#allocation7 + $0x1e8] sm:$0xff] }
 0x147   :  { %v1811_v39 = vpack.c.bf16 %v797_v38, %v796_v37 }
 0x160   :  { %v1233_v41 = vpop.f32.mrb[2].mxu0 }
 0x161   :  { %v1234_v42 = vpop.f32.mrb[3].mxu0 }
 0x162   :  { %v486_v43 = vpop.f32.mrb[2].mxu1  ;;  %v1235_v44 = vadd.f32 %v1234_v42, %v1233_v41 }
 0x163   :  { %v1389_v45 = vpop.f32.mrb[3].mxu1 }
 0x164   :  { %v417_v46 = vadd.f32 %v1235_v44, %v347_v40  ;;  %v1123_v40 = vld [vmem:[%s2293_s4 + $0x1] ss:$0 sm:$0xff]  ;;  %v798_v45 = vld [vmem:[#allocation7 + $0x1f0] sm:$0xff] }
 0x166   :  { %v487_v47 = vadd.f32 %v486_v43, %v417_v46  ;;  %v799_v46 = vld [vmem:[#allocation7 + $0x1f8] sm:$0xff] }
 0x168   :  { %v490_v48 = vmax.f32 %v487_v47, 0.0  ;;  %v1814_v47 = vpack.c.bf16 %v799_v46, %v798_v45 }
 0x16a   :  { %491 = vst [vmem:[#allocation10] sm:$0xff] %v490_v48  ;;  %1423 = vmatmul.mubr.f32.vlgmr.msra.gmra.mrb[4].mxu0 %v490_v48  ;;  %v882_v48 = vld [vmem:[#allocation7 + $0x200] sm:$0xff] }
 0x16b   :  { %1492 = vmatprep.mubr.msk.f32.mxu0 %vm2047_vm0, %v2048_v1  ;;  %1770 = vmatpush3.bf16.msra.mxu0 %v1769_v56  ;;  %v1817_v52 = vpack.c.bf16 %v883_v49, %v882_v48  ;;  %v887_v56 = vld [vmem:[#allocation7 + $0x228] sm:$0xff] }
 0x16c   :  { %1771 = vmatprep.subr.bf16.mxu0 %v2046_v51  ;;  %v1823_v57 = vpack.c.bf16 %v887_v56, %v886_v55 }
 0x16f   :  { %1773 = vmatpush3.bf16.msra.mxu0 %v1772_v58  ;;  %v888_v58 = vld [vmem:[#allocation7 + $0x230] sm:$0xff] }
 0x170   :  { %1774 = vmatprep.subr.bf16.mxu0 %v2046_v51  ;;  %v1826_v60 = vpack.c.bf16 %v889_v59, %v888_v58 }
 0x173   :  { %1776 = vmatpush3.bf16.msra.mxu0 %v1775_v61  ;;  %v890_v61 = vld [vmem:[#allocation7 + $0x240] sm:$0xff] }
 0x174   :  { %1777 = vmatprep.subr.bf16.mxu0 %v2046_v51  ;;  %v1829_v63 = vpack.c.bf16 %v891_v62, %v890_v61 }
 0x177   :  { %1779 = vmatpush3.bf16.msra.mxu0 %v1778_v0  ;;  %v892_v0 = vld [vmem:[#allocation7 + $0x250] sm:$0xff] }
 0x178   :  { %1780 = vmatprep.subr.bf16.mxu0 %v2046_v51  ;;  %v1832_v3 = vpack.c.bf16 %v893_v2, %v892_v0 }
 0x17b   :  { %1782 = vmatpush3.bf16.msra.mxu0 %v1781_v4  ;;  %v894_v4 = vld [vmem:[#allocation7 + $0x260] sm:$0xff] }
 0x17c   :  { %1783 = vmatprep.subr.bf16.mxu0 %v2046_v51  ;;  %v1835_v6 = vpack.c.bf16 %v895_v5, %v894_v4 }
 0x17f   :  { %1785 = vmatpush3.bf16.msra.mxu0 %v1784_v7  ;;  %v1125_v7 = vld [vmem:[%s2293_s4 + $0x2] ss:$0 sm:$0xff] }
 0x180   :  { %1786 = vmatprep.subr.bf16.mxu0 %v2046_v51 }
 0x183   :  { %1788 = vmatpush3.bf16.msra.mxu0 %v1787_v10 }
 0x184   :  { %1789 = vmatprep.subr.bf16.mxu0 %v2046_v51 }
 0x187   :  { %1791 = vmatpush3.bf16.msra.mxu0 %v1790_v18 }
 0x188   :  { %1816 = vmatprep.subr.bf16.mxu0 %v2046_v51 }
 0x23d   :  { %v581_v12 = vpop.f32.mrb[4].mxu0 }
 0x23e   :  { %v582_v13 = vadd.f32 %v1121_v11, %v581_v12  ;;  %v1424_v14 = vpop.f32.mrb[5].mxu0  ;;  %v896_v12 = vld [vmem:[#allocation7 + $0x270] sm:$0xff] }
 0x240   :  { %v585_v15 = vmax.f32 %v582_v13, 0.0  ;;  %v897_v13 = vld [vmem:[#allocation7 + $0x278] sm:$0xff] }
 0x241   :  { %v1838_v14 = vpack.c.bf16 %v897_v13, %v896_v12 }
 0x242   :  { %586 = vst [vmem:[#allocation11] sm:$0xff] %v585_v15  ;;  %1458 = vmatmul.mubr.f32.vlgmr.msra.gmra.mrb[4].mxu1 %v585_v15  ;;  %v979_v15 = vld [vmem:[#allocation8] sm:$0xff] }
 0x243   :  { %1527 = vmatprep.mubr.msk.f32.mxu1 %vm2047_vm0, %v2048_v1  ;;  %1794 = vmatpush3.bf16.msra.mxu1 %v1793_v22  ;;  %v1841_v18 = vpack.c.bf16 %v980_v16, %v979_v15  ;;  %v984_v22 = vld [vmem:[#allocation8 + $0x28] sm:$0xff] }
 0x244   :  { %1795 = vmatprep.subr.bf16.mxu1 %v2046_v51  ;;  %v1847_v23 = vpack.c.bf16 %v984_v22, %v983_v21 }
 0x247   :  { %1797 = vmatpush3.bf16.msra.mxu1 %v1796_v24  ;;  %v986_v24 = vld [vmem:[#allocation8 + $0x38] sm:$0xff] }
 0x248   :  { %1798 = vmatprep.subr.bf16.mxu1 %v2046_v51 }
 0x24b   :  { %1800 = vmatpush3.bf16.msra.mxu1 %v1799_v27  ;;  %v988_v27 = vld [vmem:[#allocation8 + $0x48] sm:$0xff] }
 0x24c   :  { %1801 = vmatprep.subr.bf16.mxu1 %v2046_v51  ;;  %v1853_v28 = vpack.c.bf16 %v988_v27, %v987_v26 }
 0x24f   :  { %1803 = vmatpush3.bf16.msra.mxu1 %v1802_v30  ;;  %v990_v30 = vld [vmem:[#allocation8 + $0x58] sm:$0xff] }
 0x250   :  { %1804 = vmatprep.subr.bf16.mxu1 %v2046_v51  ;;  %v1856_v31 = vpack.c.bf16 %v990_v30, %v989_v29 }
 0x253   :  { %1806 = vmatpush3.bf16.msra.mxu1 %v1805_v33  ;;  %v992_v33 = vld [vmem:[#allocation8 + $0x68] sm:$0xff] }
 0x254   :  { %1807 = vmatprep.subr.bf16.mxu1 %v2046_v51  ;;  %v1859_v34 = vpack.c.bf16 %v992_v33, %v991_v32 }
 0x257   :  { %1809 = vmatpush3.bf16.msra.mxu1 %v1808_v36 }
 0x258   :  { %1810 = vmatprep.subr.bf16.mxu1 %v2046_v51 }
 0x25b   :  { %1812 = vmatpush3.bf16.msra.mxu1 %v1811_v39 }
 0x25c   :  { %1813 = vmatprep.subr.bf16.mxu1 %v2046_v51 }
 0x25f   :  { %1815 = vmatpush3.bf16.msra.mxu1 %v1814_v47 }
 0x260   :  { %1840 = vmatprep.subr.bf16.mxu1 %v2046_v51 }
 0x315   :  { %v678_v41 = vpop.f32.mrb[4].mxu1 }
 0x316   :  { %v679_v42 = vadd.f32 %v1123_v40, %v678_v41  ;;  %v1459_v43 = vpop.f32.mrb[5].mxu1  ;;  %v993_v40 = vld [vmem:[#allocation8 + $0x70] sm:$0xff]  ;;  %v994_v41 = vld [vmem:[#allocation8 + $0x78] sm:$0xff] }
 0x317   :  { %v1129_v43 = vld [vmem:[%s2293_s4 + $0x4] ss:$0 sm:$0xff] }
 0x318   :  { %v682_v44 = vmax.f32 %v679_v42, 0.0  ;;  %v1862_v42 = vpack.c.bf16 %v994_v41, %v993_v40 }
 0x31a   :  { %684 = vst [vmem:[#allocation11 + $0x8] sm:$0xff] %v682_v44  ;;  %1493 = vmatmul.mubr.f32.vlgmr.msra.gmra.mrb[6].mxu0 %v682_v44 }
 0x31b   :  { %1562 = vmatprep.mubr.msk.f32.mxu0 %vm2047_vm0, %v2048_v1  ;;  %1818 = vmatpush3.bf16.msra.mxu0 %v1817_v52 }
 0x31c   :  { %1819 = vmatprep.subr.bf16.mxu0 %v2046_v51 }
 0x31f   :  { %1821 = vmatpush3.bf16.msra.mxu0 %v1820_v54 }
 0x320   :  { %1822 = vmatprep.subr.bf16.mxu0 %v2046_v51 }
 0x323   :  { %1824 = vmatpush3.bf16.msra.mxu0 %v1823_v57 }
 0x324   :  { %1825 = vmatprep.subr.bf16.mxu0 %v2046_v51 }
 0x327   :  { %1827 = vmatpush3.bf16.msra.mxu0 %v1826_v60 }
 0x328   :  { %1828 = vmatprep.subr.bf16.mxu0 %v2046_v51 }
 0x32b   :  { %1830 = vmatpush3.bf16.msra.mxu0 %v1829_v63 }
 0x32c   :  { %1831 = vmatprep.subr.bf16.mxu0 %v2046_v51 }
 0x32f   :  { %1833 = vmatpush3.bf16.msra.mxu0 %v1832_v3 }
 0x330   :  { %1834 = vmatprep.subr.bf16.mxu0 %v2046_v51 }
 0x333   :  { %1836 = vmatpush3.bf16.msra.mxu0 %v1835_v6 }
 0x334   :  { %1837 = vmatprep.subr.bf16.mxu0 %v2046_v51 }
 0x337   :  { %1839 = vmatpush3.bf16.msra.mxu0 %v1838_v14 }
 0x3ed   :  { %v776_v8 = vpop.f32.mrb[6].mxu0 }
 0x3ee   :  { %v777_v9 = vadd.f32 %v1125_v7, %v776_v8  ;;  %v1494_v10 = vpop.f32.mrb[7].mxu0 }
 0x3f0   :  { %v780_v11 = vmax.f32 %v777_v9, 0.0 }
 0x3f2   :  { %782 = vst [vmem:[#allocation11 + $0x10] sm:$0xff] %v780_v11  ;;  %1528 = vmatmul.mubr.f32.vlgmr.msra.gmra.mrb[6].mxu1 %v780_v11 }
 0x3f3   :  { %1597 = vmatprep.mubr.msk.f32.mxu1 %vm2047_vm0, %v2048_v1  ;;  %1842 = vmatpush3.bf16.msra.mxu1 %v1841_v18  ;;  %v985_v1 = vld [vmem:[#allocation8 + $0x30] sm:$0xff] }
 0x3f4   :  { %1843 = vmatprep.subr.bf16.mxu1 %v2046_v51  ;;  %v1850_v25 = vpack.c.bf16 %v986_v24, %v985_v1 }
 0x3f7   :  { %1845 = vmatpush3.bf16.msra.mxu1 %v1844_v20 }
 0x3f8   :  { %1846 = vmatprep.subr.bf16.mxu1 %v2046_v51 }
 0x3fb   :  { %1848 = vmatpush3.bf16.msra.mxu1 %v1847_v23 }
 0x3fc   :  { %1849 = vmatprep.subr.bf16.mxu1 %v2046_v51 }
 0x3ff   :  { %1851 = vmatpush3.bf16.msra.mxu1 %v1850_v25 }
 0x400   :  { %1852 = vmatprep.subr.bf16.mxu1 %v2046_v51 }
 0x403   :  { %1854 = vmatpush3.bf16.msra.mxu1 %v1853_v28 }
 0x404   :  { %1855 = vmatprep.subr.bf16.mxu1 %v2046_v51 }
 0x407   :  { %1857 = vmatpush3.bf16.msra.mxu1 %v1856_v31 }
 0x408   :  { %1858 = vmatprep.subr.bf16.mxu1 %v2046_v51 }
 0x40b   :  { %1860 = vmatpush3.bf16.msra.mxu1 %v1859_v34 }
 0x40c   :  { %1861 = vmatprep.subr.bf16.mxu1 %v2046_v51 }
 0x40f   :  { %1863 = vmatpush3.bf16.msra.mxu1 %v1862_v42 }
 0x4c5   :  { %v874_v36 = vpop.f32.mrb[6].mxu1 }
 0x4c6   :  { %v875_v37 = vadd.f32 %v1127_v35, %v874_v36  ;;  %v1529_v38 = vpop.f32.mrb[7].mxu1 }
 0x4c8   :  { %v878_v39 = vmax.f32 %v875_v37, 0.0 }
 0x4ca   :  { %880 = vst [vmem:[#allocation11 + $0x18] sm:$0xff] %v878_v39  ;;  %1563 = vmatmul.mubr.f32.vlgmr.msra.gmra.mrb[8].mxu0 %v878_v39 }
 0x59d   :  { %v972_v44 = vpop.f32.mrb[8].mxu0 }
 0x59e   :  { %v973_v51 = vadd.f32 %v1129_v43, %v972_v44  ;;  %v1564_v45 = vpop.f32.mrb[9].mxu0 }
 0x5a0   :  { %v976_v46 = vmax.f32 %v973_v51, 0.0 }
 0x5a2   :  { %978 = vst [vmem:[#allocation11 + $0x20] sm:$0xff] %v976_v46  ;;  %1598 = vmatmul.mubr.f32.vlgmr.msra.gmra.mrb[8].mxu1 %v976_v46 }
 0x5a3   :  { %1975 = shalt.err (!%p1972_p8)
}
 0x5a4   :  { %s1976_s13 = scalar_lea.hbm %s2297_s8, 640 }
 0x5a5   :  { %p1977_p9 = scmp.ne.s32.totalorder %s2297_s8, %s1976_s13  ;;  %p1980_p10 = scmp.lt.u32.totalorder %s1976_s13, %s2297_s8 }
 0x5a7   :  { %p1982_p11 = pnand %p1980_p10, %p1977_p9 }
 0x5a9   :  { %1985 = shalt.err (!%p1982_p11)
}
 0x5aa   :  { %1095 = dma.vmem_to_hbm [thread:$0]  %s1090_s28, 640, %s2297_s8, [#allocation12], %s2041_s19, %s2041_s19, %s2042_s20  }
 0x5ab   :  { %s1986_s15 = scalar_lea.vmem %s1081_s30, 128  ;;  %p1991_p13 = scmp.lt.s32.totalorder %s1081_s30, %s1081_s30 }
 0x5ac   :  { %p1987_p12 = scmp.ne.s32.totalorder %s1081_s30, %s1986_s15  ;;  %p1992_p0 = scmp.lt.s32.totalorder %s1986_s15, %s1986_s15 }
 0x5ae   :  { %p1993_p1 = por %p1992_p0, %p1991_p13 }
 0x5b0   :  { %p1994_p2 = pnand %p1993_p1, %p1987_p12 }
 0x5b2   :  { %1997 = shalt.err (!%p1994_p2)
}
 0x5b3   :  { %s1998_s17 = scalar_lea.hbm %s2296_s7, 128 }
 0x5b4   :  { %p1999_p3 = scmp.ne.s32.totalorder %s2296_s7, %s1998_s17  ;;  %p2002_p4 = scmp.lt.u32.totalorder %s1998_s17, %s2296_s7 }
 0x5b6   :  { %p2004_p5 = pnand %p2002_p4, %p1999_p3 }
 0x5b8   :  { %2007 = shalt.err (!%p2004_p5)
}
 0x5b9   :  { %1083 = dma.vmem_to_hbm [thread:$0]  %s1081_s30, 128, %s2296_s7, [#allocation4]   ;;  %v1130_v47 = vld [vmem:[%s2295_s6] ss:$0 sm:$0xff] }
 0x5ba   :  { %s2051_s0 = smov [#allocation13]  }
 0x5bb   :  { %s1102_s24 = sshll.u32 %s2051_s0, 4  ;;  %s1103_s24 = int_to_ptr.vmem [resolvable:$true] %s1102_s24 }
 0x5bc   :  { %s2008_s27 = scalar_lea.vmem %s1103_s24, 128  ;;  %p2013_p7 = scmp.lt.s32.totalorder %s1103_s24, %s1103_s24 }
 0x5bd   :  { %p2009_p6 = scmp.ne.s32.totalorder %s1103_s24, %s2008_s27  ;;  %p2014_p8 = scmp.lt.s32.totalorder %s2008_s27, %s2008_s27 }
 0x5bf   :  { %p2015_p9 = por %p2014_p8, %p2013_p7 }
 0x5c1   :  { %p2016_p10 = pnand %p2015_p9, %p2009_p6 }
 0x675   :  { %v1068_v48 = vpop.f32.mrb[8].mxu1 }
 0x676   :  { %v1069_v49 = vadd.f32 %v1130_v47, %v1068_v48  ;;  %v1599_v50 = vpop.f32.mrb[9].mxu1 }
 0x678   :  { %v1072_v52 = vmax.f32 %v1069_v49, 0.0 }
 0x67a   :  { %1073 = vst [vmem:[#allocation13] sm:$0xff] %v1072_v52 }
 0x67b   :  { %2019 = shalt.err (!%p2016_p10)
}
 0x67c   :  { %s2020_s29 = scalar_lea.hbm %s2298_s9, 128 }
 0x67d   :  { %p2021_p11 = scmp.ne.s32.totalorder %s2298_s9, %s2020_s29  ;;  %p2024_p12 = scmp.lt.u32.totalorder %s2020_s29, %s2298_s9 }
 0x67f   :  { %p2026_p13 = pnand %p2024_p12, %p2021_p11 }
 0x681   :  { %2029 = shalt.err (!%p2026_p13)
}
 0x682   :  { %1105 = dma.vmem_to_hbm [thread:$0]  %s1103_s24, 128, %s2298_s9, [#allocation12]  }
 0x683   :  { %2036 = dma.done.wait [#allocation4], 128  }
 0x684   :  { %2037 = vsyncadd [#allocation4], 4294967168 }
 0x685   :  { %2038 = dma.done.wait [#allocation12], 768  }
 0x686   :  { %2039 = vsyncadd [#allocation12], 4294966528 }
 0x687   :  { %1115 = vsyncpa [#allocation3], 1 }
 0x688   :  { %1116 = vsyncpa [#allocation6], 1 }
 0x689   :  { %1117 = vsyncpa [#allocation9], 1 }
 0x68a   :  { %1118 = vsyncpa [#allocation4], 1 }
 0x68b   :  { %1119 = vsyncpa [#allocation12], 1 }

</bundles_post_ra>
